<compile_context>
chip_gen: v5e
topology: v5e:2x2
jax: 0.10.0
libtpu: 0.0.40
codegen_flags: <defaults>
</compile_context>

<pallas_src>
import functools

import jax
import jax.numpy as jnp
from jax.experimental import pallas as pl
from jax.experimental.pallas import tpu as pltpu

ALPHA = -0.5
BETA = -0.5

_TILE_N_CAP = 16384            # lanes; DMA/overhead amortization saturates well below this
_VMEM_TILE_BUDGET = 16 << 20   # bytes of live VMEM the tile derivation targets
_VMEM_LIMIT_BYTES = 48 << 20   # scoped VMEM limit (>=v5e default 16MiB, < v7x 64MiB physical)


def _jacobi_recurrence_coeffs(i, a, b):
    A = (2 * i + a + b - 1) * (2 * i + a + b) / (2 * i * (i + a + b))
    B = (2 * i + a + b - 1) * (a ** 2 - b ** 2) / (
        2 * i * (i + a + b) * (2 * i + a + b - 2))
    C = -2 * (i + a - 1) * (i + b - 1) * (2 * i + a + b) / (
        2 * i * (i + a + b) * (2 * i + a + b - 2))
    return A, B, C


def _kan_kernel(x_ref, w_ref, bias_ref, o_ref, *, degree, a, b):
    # x_ref: (I, TN) points-in-lanes tile; w_ref: (O, degree*I) fused weights;
    # bias_ref: (O, 1) degree-0 contribution; o_ref: (O, TN) lane-dense output.
    bias = bias_ref[...].astype(jnp.float32)                  # (O, 1)
    acc = jnp.broadcast_to(bias, o_ref.shape)                 # degree-0 term

    if degree > 0:
        input_dim = x_ref.shape[0]
        x = jnp.tanh(x_ref[...].astype(jnp.float32))          # (I, TN)
        w = w_ref[...].astype(jnp.float32)                    # (O, D*I)

        # Degree 1 (degree-0 == 1 already folded into the bias/accumulator).
        j_prev2 = jnp.ones_like(x)
        j_prev = (a - b + (a + b + 2.0) * x) * 0.5
        acc = acc + jnp.dot(w[:, 0:input_dim], j_prev,
                            preferred_element_type=jnp.float32)

        # Three-term recurrence; degree is small & static -> unrolled at trace
        # time, each degree contributes its own tiny dot (no (D*I,TN) concat).
        for i in range(2, degree + 1):
            A, B, C = _jacobi_recurrence_coeffs(i, a, b)
            j_cur = (A * x + B) * j_prev + C * j_prev2
            acc = acc + jnp.dot(w[:, (i - 1) * input_dim:i * input_dim], j_cur,
                                preferred_element_type=jnp.float32)
            j_prev2, j_prev = j_prev, j_cur

    o_ref[...] = acc.astype(o_ref.dtype)


def _pick_tile_n(N, B, I, O, in_bytes):
    # Live bytes per lane-column: double-buffered x/out blocks + f32 temporaries
    # (x, j_prev2, j_prev, j_cur -> ~4I rows; acc -> O rows).
    bytes_per_lane = 4 * (4 * I + O) + 2 * in_bytes * I + 2 * in_bytes * O
    tile_n = _VMEM_TILE_BUDGET // max(bytes_per_lane, 1)
    tile_n = max(128, min(tile_n, _TILE_N_CAP))
    tile_n = (tile_n // 128) * 128
    # Never bigger than N rounded up to a lane multiple.
    tile_n = min(tile_n, ((N + 127) // 128) * 128)
    # v7x has 2 TensorCores: keep >= 2 grid steps when B == 1 so both get work.
    if B == 1 and tile_n >= N and N > 128:
        half = -(-N // 2)
        tile_n = max(128, ((half + 127) // 128) * 128)
    return tile_n


def kanshared_forward(x, jacobi_coeffs, degree, a=ALPHA, b=BETA, tile_n=None):
    """x: (B, input_dim, N); jacobi_coeffs: (input_dim, output_dim, degree+1).

    Returns y: (B, output_dim, N), matching torch einsum('bids,iod->bos')."""
    B, I, N = x.shape
    O = jacobi_coeffs.shape[1]
    D = degree

    # Weights: (I, O, D+1) -> (D+1, I, O); tiny, done once on the XLA side.
    w_dio = jnp.transpose(jacobi_coeffs, (2, 0, 1)).astype(jnp.float32)
    # Degree-0 polynomial is all-ones -> its contribution is a bias.
    bias = jnp.sum(w_dio[0], axis=0).reshape(O, 1)                  # (O, 1)
    if D > 0:
        w_mat = jnp.transpose(w_dio[1:].reshape(D * I, O), (1, 0))  # (O, D*I)
    else:
        w_mat = jnp.zeros((O, I), dtype=jnp.float32)                # unused

    if tile_n is None:
        tile_n = _pick_tile_n(N, B, I, O, jnp.dtype(x.dtype).itemsize)
    grid_n = pl.cdiv(N, tile_n)

    kernel = functools.partial(_kan_kernel, degree=D, a=a, b=b)

    y = pl.pallas_call(
        kernel,
        out_shape=jax.ShapeDtypeStruct((B, O, N), x.dtype),
        grid_spec=pltpu.PrefetchScalarGridSpec(
            num_scalar_prefetch=0,
            grid=(B, grid_n),
            in_specs=[
                pl.BlockSpec((None, I, tile_n), lambda bi, ni: (bi, 0, ni)),
                pl.BlockSpec((O, w_mat.shape[1]), lambda bi, ni: (0, 0)),
                pl.BlockSpec((O, 1), lambda bi, ni: (0, 0)),
            ],
            out_specs=pl.BlockSpec((None, O, tile_n), lambda bi, ni: (bi, 0, ni)),
        ),
        compiler_params=pltpu.CompilerParams(
            dimension_semantics=("parallel", "parallel"),
            vmem_limit_bytes=_VMEM_LIMIT_BYTES),
    )(x, w_mat, bias)
    return y


def _reference(x, coeffs, degree, a=ALPHA, b=BETA):
    # Pure-JAX replica of the torch forward for verification.
    xt = jnp.tanh(jnp.transpose(x, (0, 2, 1)))              # (B, N, I)
    polys = [jnp.ones_like(xt)]
    if degree > 0:
        polys.append((a - b + (a + b + 2.0) * xt) / 2.0)
    for i in range(2, degree + 1):
        A, Bc, C = _jacobi_recurrence_coeffs(i, a, b)
        polys.append((A * xt + Bc) * polys[-1] + C * polys[-2])
    jac = jnp.stack(polys, axis=-1)                          # (B, N, I, D+1)
    jac = jnp.transpose(jac, (0, 2, 3, 1))                   # (B, I, D+1, N)
    return jnp.einsum('bids,iod->bos', jac, coeffs)


if __name__ == "__main__":
    key = jax.random.PRNGKey(0)
    k_x, k_w = jax.random.split(key)

    batch = 2
    input_dim = 4
    output_dim = 8
    degree = 3
    num_points = 256

    x = jax.random.normal(k_x, (batch, input_dim, num_points), dtype=jnp.float32)
    std = 1.0 / (input_dim * (degree + 1))
    jacobi_coeffs = std * jax.random.normal(
        k_w, (input_dim, output_dim, degree + 1), dtype=jnp.float32)

    # f32 path
    y = jax.block_until_ready(kanshared_forward(x, jacobi_coeffs, degree))
    y_ref = _reference(x, jacobi_coeffs, degree)
    assert y.shape == (batch, output_dim, num_points), y.shape
    max_err = float(jnp.max(jnp.abs(y - y_ref)))
    assert max_err < 1e-4, f"f32 mismatch vs reference: {max_err}"

    # Uneven N: exercises the no-pad edge-block (masked tail lanes) path.
    n2 = 200
    x2 = x[:, :, :n2]
    y2 = jax.block_until_ready(kanshared_forward(x2, jacobi_coeffs, degree))
    y2_ref = _reference(x2, jacobi_coeffs, degree)
    assert y2.shape == (batch, output_dim, n2), y2.shape
    max_err2 = float(jnp.max(jnp.abs(y2 - y2_ref)))
    assert max_err2 < 1e-4, f"uneven-N mismatch vs reference: {max_err2}"

    # bf16 I/O path (compute stays f32 inside the kernel).
    xb = x.astype(jnp.bfloat16)
    yb = jax.block_until_ready(kanshared_forward(xb, jacobi_coeffs, degree))
    assert yb.dtype == jnp.bfloat16, yb.dtype
    max_err_b = float(jnp.max(jnp.abs(yb.astype(jnp.float32) - y_ref)))
    assert max_err_b < 3e-2, f"bf16 mismatch vs reference: {max_err_b}"

    print("KERNEL_OK")
</pallas_src>

<mosaic_0001>
module attributes {stable_mosaic.version = 11 : i64} {
  func.func @_kan_kernel(%arg0: i32, %arg1: i32, %arg2: memref<1x4x256xf32, #tpu.memory_space<vmem>>, %arg3: memref<8x12xf32, #tpu.memory_space<vmem>>, %arg4: memref<8x1xf32, #tpu.memory_space<vmem>>, %arg5: memref<1x8x256xf32, #tpu.memory_space<vmem>>) attributes {dimension_semantics = [#tpu.dimension_semantics<parallel>, #tpu.dimension_semantics<parallel>], iteration_bounds = array<i64: 2, 1>, scalar_prefetch = 0 : i64, scratch_operands = 0 : i64, tpu.core_type = #tpu.core_type<tc>, window_params = [{transform_indices = @transform_0, window_bounds = array<i64: 1, 4, 256>}, {pipeline_mode = #tpu.pipeline_mode<synchronous>, transform_indices = @transform_1, window_bounds = array<i64: 8, 12>}, {pipeline_mode = #tpu.pipeline_mode<synchronous>, transform_indices = @transform_2, window_bounds = array<i64: 8, 1>}, {transform_indices = @transform_3, window_bounds = array<i64: 1, 8, 256>}]} {
    %c0 = arith.constant 0 : index
    %c0_0 = arith.constant 0 : index
    %0 = vector.load %arg4[%c0, %c0_0] : memref<8x1xf32, #tpu.memory_space<vmem>>, vector<8x1xf32>
    %1 = vector.shape_cast %0 : vector<8x1xf32> to vector<8x1xf32>
    %2 = vector.broadcast %1 : vector<8x1xf32> to vector<8x256xf32>
    %c0_1 = arith.constant 0 : index
    %c0_2 = arith.constant 0 : index
    %c0_3 = arith.constant 0 : index
    %3 = vector.load %arg2[%c0_1, %c0_2, %c0_3] : memref<1x4x256xf32, #tpu.memory_space<vmem>>, vector<1x4x256xf32>
    %4 = vector.shape_cast %3 : vector<1x4x256xf32> to vector<4x256xf32>
    %5 = math.tanh %4 : vector<4x256xf32>
    %c0_4 = arith.constant 0 : index
    %c0_5 = arith.constant 0 : index
    %6 = vector.load %arg3[%c0_4, %c0_5] : memref<8x12xf32, #tpu.memory_space<vmem>>, vector<8x12xf32>
    %cst = arith.constant 1.000000e+00 : f32
    %7 = vector.broadcast %cst : f32 to vector<4x256xf32>
    %cst_6 = arith.constant 1.000000e+00 : f32
    %8 = vector.broadcast %cst_6 : f32 to vector<4x256xf32>
    %9 = arith.mulf %8, %5 : vector<4x256xf32>
    %cst_7 = arith.constant 0.000000e+00 : f32
    %10 = vector.broadcast %cst_7 : f32 to vector<4x256xf32>
    %11 = arith.addf %10, %9 : vector<4x256xf32>
    %cst_8 = arith.constant 5.000000e-01 : f32
    %12 = vector.broadcast %cst_8 : f32 to vector<4x256xf32>
    %13 = arith.mulf %11, %12 : vector<4x256xf32>
    %14 = vector.extract_strided_slice %6 {offsets = [0, 0], sizes = [8, 4], strides = [1, 1]} : vector<8x12xf32> to vector<8x4xf32>
    %cst_9 = arith.constant dense<0.000000e+00> : vector<8x256xf32>
    %15 = tpu.matmul %14, %13, %cst_9 {dimension_numbers = #tpu.dot_dimension_numbers<[1], [0], [0], [1], [0, 0, 1, 1], [], []>} : vector<8x4xf32>, vector<4x256xf32>, vector<8x256xf32> -> vector<8x256xf32>
    %16 = arith.addf %2, %15 : vector<8x256xf32>
    %cst_10 = arith.constant 1.500000e+00 : f32
    %17 = vector.broadcast %cst_10 : f32 to vector<4x256xf32>
    %18 = arith.mulf %17, %5 : vector<4x256xf32>
    %cst_11 = arith.constant 0.000000e+00 : f32
    %19 = vector.broadcast %cst_11 : f32 to vector<4x256xf32>
    %20 = arith.addf %18, %19 : vector<4x256xf32>
    %21 = arith.mulf %20, %13 : vector<4x256xf32>
    %cst_12 = arith.constant -3.750000e-01 : f32
    %22 = vector.broadcast %cst_12 : f32 to vector<4x256xf32>
    %23 = arith.mulf %22, %7 : vector<4x256xf32>
    %24 = arith.addf %21, %23 : vector<4x256xf32>
    %25 = vector.extract_strided_slice %6 {offsets = [0, 4], sizes = [8, 4], strides = [1, 1]} : vector<8x12xf32> to vector<8x4xf32>
    %cst_13 = arith.constant dense<0.000000e+00> : vector<8x256xf32>
    %26 = tpu.matmul %25, %24, %cst_13 {dimension_numbers = #tpu.dot_dimension_numbers<[1], [0], [0], [1], [0, 0, 1, 1], [], []>} : vector<8x4xf32>, vector<4x256xf32>, vector<8x256xf32> -> vector<8x256xf32>
    %27 = arith.addf %16, %26 : vector<8x256xf32>
    %cst_14 = arith.constant 1.66666663 : f32
    %28 = vector.broadcast %cst_14 : f32 to vector<4x256xf32>
    %29 = arith.mulf %28, %5 : vector<4x256xf32>
    %cst_15 = arith.constant 0.000000e+00 : f32
    %30 = vector.broadcast %cst_15 : f32 to vector<4x256xf32>
    %31 = arith.addf %29, %30 : vector<4x256xf32>
    %32 = arith.mulf %31, %24 : vector<4x256xf32>
    %cst_16 = arith.constant -6.250000e-01 : f32
    %33 = vector.broadcast %cst_16 : f32 to vector<4x256xf32>
    %34 = arith.mulf %33, %13 : vector<4x256xf32>
    %35 = arith.addf %32, %34 : vector<4x256xf32>
    %36 = vector.extract_strided_slice %6 {offsets = [0, 8], sizes = [8, 4], strides = [1, 1]} : vector<8x12xf32> to vector<8x4xf32>
    %cst_17 = arith.constant dense<0.000000e+00> : vector<8x256xf32>
    %37 = tpu.matmul %36, %35, %cst_17 {dimension_numbers = #tpu.dot_dimension_numbers<[1], [0], [0], [1], [0, 0, 1, 1], [], []>} : vector<8x4xf32>, vector<4x256xf32>, vector<8x256xf32> -> vector<8x256xf32>
    %38 = arith.addf %27, %37 : vector<8x256xf32>
    %c0_18 = arith.constant 0 : index
    %c0_19 = arith.constant 0 : index
    %c0_20 = arith.constant 0 : index
    %39 = vector.load %arg5[%c0_18, %c0_19, %c0_20] : memref<1x8x256xf32, #tpu.memory_space<vmem>>, vector<1x8x256xf32>
    %40 = vector.shape_cast %39 : vector<1x8x256xf32> to vector<8x256xf32>
    %41 = vector.shape_cast %38 : vector<8x256xf32> to vector<1x8x256xf32>
    tpu.vector_store %arg5[%c0_18, %c0_19, %c0_20], %41 {strides = array<i32>} : memref<1x8x256xf32, #tpu.memory_space<vmem>>, vector<1x8x256xf32>,
    return
  }
  func.func @transform_0(%arg0: i32, %arg1: i32) -> (i32, i32, i32) {
    %c0_i32 = arith.constant 0 : i32
    %c0_i32_0 = arith.constant 0 : i32
    return %arg0, %c0_i32, %arg1 : i32, i32, i32
  }
  func.func @transform_1(%arg0: i32, %arg1: i32) -> (i32, i32) {
    %c0_i32 = arith.constant 0 : i32
    %c0_i32_0 = arith.constant 0 : i32
    %c0_i32_1 = arith.constant 0 : i32
    return %c0_i32, %c0_i32_0 : i32, i32
  }
  func.func @transform_2(%arg0: i32, %arg1: i32) -> (i32, i32) {
    %c0_i32 = arith.constant 0 : i32
    %c0_i32_0 = arith.constant 0 : i32
    %c0_i32_1 = arith.constant 0 : i32
    return %c0_i32, %c0_i32_0 : i32, i32
  }
  func.func @transform_3(%arg0: i32, %arg1: i32) -> (i32, i32, i32) {
    %c0_i32 = arith.constant 0 : i32
    %c0_i32_0 = arith.constant 0 : i32
    return %arg0, %c0_i32, %arg1 : i32, i32, i32
  }
}

</mosaic_0001>

<bundles_post_ra>
// kernel: tpu_custom_call.1
= control target key start
LH: loop header
LB: loop body
LE: loop exit
PB: predicated region body
PF: predicated region fallthrough
CT: control target
= control target key end

     0   :  { %8 = vsyncpa [#allocation3], 0  ;;  %s865_s0 = inlined_call_operand.hbm [shape: f32[2,4,256], index: 0, kind: input, shape index: {}]   ;;  %s866_s1 = inlined_call_operand.vmem [shape: f32[8,12], index: 1, kind: input, shape index: {}]   ;;  %s867_s2 = inlined_call_operand.vmem [shape: f32[8,1], index: 2, kind: input, shape index: {}]   ;;  %s868_s3 = inlined_call_operand.hbm [shape: f32[2,8,256], index: 3, kind: output, shape index: {}]  }
   0x1   :  { %10 = vsyncpa [#allocation3 + $0x1], 0 }
   0x2   :  { %11 = vsyncpa [#allocation4], 0 }
   0x3   :  { %13 = vsyncpa [#allocation4 + $0x1], 0  ;;  %s732_s12 = smov 0   ;;  %s734_s13 = smov 0  }
   0x4   :  { %s736_s14 = smov 0   ;;  %s738_s15 = smov 0  }
   0x5   :  { %s740_s16 = smov 0   ;;  %s742_s17 = smov 0  }
   0x6 LB: > { %s497_s18 = sadd.s32 4294967295, %s707_s17   ;;  %s498_s19 = sadd.s32 4294967294, %s707_s17   ;;  %s707_s17 = sphi %s742_s17, %s19_s17   ;;  %s703_s16 = sphi %s740_s16, %s877_s16   ;;  %s699_s15 = sphi %s738_s15, %s876_s15   ;;  %s695_s14 = sphi %s736_s14, %s875_s14   ;;  %s691_s13 = sphi %s734_s13, %s874_s13   ;;  %s687_s12 = sphi %s732_s12, %s873_s12  }
   0x7   : > { %s31_s20 = sadd.s32 1, %s703_s16  ;;  %s40_s21 = sadd.s32 1, %s695_s14 }
   0x8   : > { %p33_p0 = scmp.ge.s32.totalorder %s31_s20, 2  ;;  %p47_p1 = scmp.ne.s32.totalorder %s695_s14, %s691_s13 }
   0x9   : > { %p48_p2 = scmp.eq.s32.totalorder %s707_s17, 0  ;;  %p53_p3 = scmp.ne.s32.totalorder %s691_s13, %s687_s12 }
   0xa   : > { %s879_s20 = smov (%p33_p0, %s31_s20), 0  ;;  %p54_p5 = scmp.eq.s32.totalorder %s497_s18, 0 }
   0xb   : > { %p773_p4 = por %p48_p2, %p47_p1  ;;  %s35_s23 = ssub.s32 %s703_s16, %s879_s20 }
   0xc   : > { %p121_p6 = scmp.eq.s32.totalorder %s497_s18, 1  ;;  %p38_p7 = scmp.eq.s32.totalorder %s35_s23, 0 }
   0xd   : > { %p779_p8 = por %p54_p5, %p53_p3  ;;  %p127_p10 = scmp.eq.s32.totalorder %s498_s19, 1 }
   0xe   : > { %p783_p9 = por %p121_p6, %p47_p1  ;;  %p500_p12 = scmp.ge.s32.totalorder %s707_s17, 2 }
   0xf   : > { %s788_s26 = scalar_select %p38_p7, %s695_s14, %s40_s21  }
  0x10   : > { %p790_p11 = por %p127_p10, %p53_p3  ;;  %p538_p13 = scmp.lt.s32.totalorder %s707_s17, 2 }
  0x11   : > { %s153_s28 = sand.u32 1, %s695_s14   ;;  %s524_s30 = sshll.u32 %s703_s16, 3 }
  0x12   : > { %s501_s29 = sshll.u32 %s153_s28, 3  ;;  %s164_s6 = scalar_lea.hbm %s865_s0, %s524_s30 }
  0x13   : > { %s157_s7 = scalar_lea.vmem [#allocation2], %s501_s29  ;;  %s166_s9 = sshll.u32 %s164_s6, 4  ;;  %s167_s9 = int_to_ptr.hbm [resolvable:$true] %s166_s9 }
  0x14   : > { %s168_s8 = sshll.u32 %s157_s7, 4  ;;  %p531_p0 = pnand %p538_p13, %p773_p4  ;;  %s169_s8 = int_to_ptr.vmem [resolvable:$true] %s168_s8 }
  0x15   : > { %p504_p1 = scmp.ge.s32.totalorder %s707_s17, 1  ;;  %p173_p2 = scmp.lt.s32.totalorder %s707_s17, 3 }
  0x16   : > { %s154_s10 = scalar_lea.sflag [#allocation3], %s153_s28 }
  0x17   : > { %533 = dma.hbm_to_vmem [thread:$0]  (!%p531_p0), %s167_s9, 128, %s169_s8, %s154_s10  }
  0x18   : > { %p174_p3 = pnand %p504_p1, %p173_p2 }
  0x19   : > { %s806_s11 = sand.u32 (!%p174_p3), 1, %s691_s13  }
  0x1a   : > { %177 = sbr.rel (%p174_p3) target bundleno = 288 (0x120), region = 32  ;;  %s505_s18 = sshll.u32 (!%p174_p3), %s806_s11, 3 }
  0x1b   : > { %s180_s19 = scalar_lea.sflag (!%p174_p3), [#allocation3], %s806_s11  ;;  %s183_s21 = scalar_lea.vmem (!%p174_p3), [#allocation2], %s505_s18 }
  0x1f   : > { %678 = dma.done.wait (%p779_p8), %s180_s19, 128  }
  0x20   : > { %680 = vsyncadd (%p779_p8), %s180_s19, 4294967168  ;;  %v217_v0 = vld [vmem:[%s866_s1] sm:$0xff]  ;;  %s709_s28 = smov 124   ;;  %s710_s29 = smov 120   ;;  %v215_v1 = vld [vmem:[%s183_s21] sm:$0xff]  ;;  %vm228_vm0 = vcmask 1043456  }
  0x21   : > { %279 = vrot.lane.b32.xlu0 %v217_v0, %s709_s28  ;;  %593 = vtanh.f32 %v215_v1  ;;  %vm224_vm1 = vcmask 31744   ;;  %v209_v17 = vld [vmem:[%s867_s2] sm:$0xff]  ;;  %v711_v18 = vmov 0   ;;  %s506_s4 = sshll.u32 %s806_s11, 4  ;;  %s525_s5 = sshll.u32 %s699_s15, 4 }
  0x22   : > { %591 = vset.pattern.permute.xlu1 %v711_v18  ;;  %592 = vset.pattern.permute.xlu0 %v711_v18  ;;  %s408_s8 = scalar_lea.hbm %s868_s3, %s525_s5  ;;  %s206_s9 = scalar_lea.vmem [#allocation5], %s506_s4 }
  0x23   : > { %212 = vperm.xlu1 %591, %v209_v17   ;;  %s410_s10 = sshll.u32 %s206_s9, 4  ;;  %s412_s18 = sshll.u32 %s408_s8, 4  ;;  %s411_s10 = int_to_ptr.vmem [resolvable:$true] %s410_s10  ;;  %s413_s18 = int_to_ptr.hbm [resolvable:$true] %s412_s18 }
  0x24   : > { %s395_s15 = scalar_lea.sflag [#allocation4], %s806_s11  ;;  %s639_s19 = sshra.s32 %s413_s18, 4  ;;  %s640_s19 = int_to_ptr.hbm [resolvable:$true] %s639_s19 }
  0x25   : > { %s641_s21 = scalar_lea.hbm %s640_s19, 16  ;;  %s645_s28 = scalar_lea.hbm %s868_s3, 32 }
  0x26   : > { %p642_p4 = scmp.ne.s32.totalorder %s640_s19, %s641_s21  ;;  %p646_p7 = scmp.lt.s32.totalorder %s640_s19, %s868_s3 }
  0x27   : > { %v594_v2 = vpop.eup %593  ;;  %p647_p8 = scmp.lt.s32.totalorder %s645_s28, %s641_s21 }
  0x28   : > { %v219_v3 = vmul.f32 0.5, %v594_v2  ;;  %v275_v4 = vmul.f32 1.5, %v594_v2  ;;  %v333_v9 = vmul.f32 1.6666666, %v594_v2  ;;  %p643_p5 = pnand %p642_p4, %p783_p9 }
  0x29   : > { %338 = vrot.lane.b32.xlu0 %v217_v0, %s710_s29  ;;  %p648_p10 = por %p647_p8, %p646_p7 }
  0x2a   : > { %221 = vst [vmem:[#allocation1] ss:$2 sm:$0xff] %v219_v3  ;;  %v277_v5 = vmul.f32 %v275_v4, %v219_v3  ;;  %v336_v11 = vmul.f32 -0.625, %v219_v3  ;;  %p644_p6 = pneg %p643_p5 }
  0x2c   : > { %v278_v6 = vadd.f32 -0.375, %v277_v5  ;;  %p649_p13 = pnand %p648_p10, %p644_p6 }
  0x2e   : > { %v335_v10 = vmul.f32 %v333_v9, %v278_v6 }
  0x30   : > { %v337_v12 = vadd.f32 %v336_v11, %v335_v10 }
  0x31   : > { %v222_v7 = vld.sshfl [vmem:[#allocation1] sm:$0xff pattern:$0x75316420]  ;;  %v223_v8 = vld.sshfl [vmem:[#allocation1 + $0x8] sm:$0xff pattern:$0x75316420] }
  0x32   : > { %282 = vst [vmem:[#allocation1] ss:$2 sm:$0xff] %v278_v6  ;;  %507 = vmatpush.msk.msra.mxu0 %vm228_vm0, %v222_v7  ;;  %509 = vmatpush.msk.msra.mxu1 %vm228_vm0, %v223_v8 }
  0x33   : > { %508 = vmatmul.msk.f32.vlgmr.msra.gmra.mxu0 %vm224_vm1, %v217_v0  ;;  %510 = vmatmul.msk.f32.vlgmr.msra.gmra.mxu1 %vm224_vm1, %v217_v0 }
  0x39   : > { %v283_v13 = vld.sshfl [vmem:[#allocation1] sm:$0xff pattern:$0x75316420]  ;;  %v284_v14 = vld.sshfl [vmem:[#allocation1 + $0x8] sm:$0xff pattern:$0x75316420] }
  0x3a   : > { %511 = vmatpush.msk.msra.mxu2 %vm228_vm0, %v283_v13  ;;  %513 = vmatpush.msk.msra.mxu3 %vm228_vm0, %v284_v14  ;;  %341 = vst [vmem:[#allocation1] ss:$2 sm:$0xff] %v337_v12 }
  0x41   : > { %v342_v15 = vld.sshfl [vmem:[#allocation1] sm:$0xff pattern:$0x75316420]  ;;  %v343_v16 = vld.sshfl [vmem:[#allocation1 + $0x8] sm:$0xff pattern:$0x75316420] }
  0x42   : > { %515 = vmatpush.msk.msrb.mxu0 %vm228_vm0, %v342_v15  ;;  %517 = vmatpush.msk.msrb.mxu1 %vm228_vm0, %v343_v16 }
  0x93   : > { %v280_v19 = vpop.permute.xlu0 %279 }
  0x94   : > { %512 = vmatmul.msk.f32.vlgmr.msra.gmra.mxu2 %vm224_vm1, %v280_v19  ;;  %514 = vmatmul.msk.f32.vlgmr.msra.gmra.mxu3 %vm224_vm1, %v280_v19 }
  0x95   : > { %v213_v23 = vpop.permute.xlu1 %212 }
  0x9b   : > { %v339_v20 = vpop.permute.xlu0 %338 }
  0x9c   : > { %516 = vmatmul.msk.f32.vlgmr.msrb.gmra.mxu0 %vm224_vm1, %v339_v20  ;;  %518 = vmatmul.msk.f32.vlgmr.msrb.gmra.mxu1 %vm224_vm1, %v339_v20 }
  0xb0   : > { %v250_v21 = vpop.f32.mrf.mxu0  ;;  %v270_v22 = vpop.f32.mrf.mxu1 }
  0xb1   : > { %v273_v24 = vadd.f32 %v250_v21, %v213_v23  ;;  %v274_v25 = vadd.f32 %v270_v22, %v213_v23 }
 0x117   : > { %v308_v26 = vpop.f32.mrf.mxu2  ;;  %v328_v27 = vpop.f32.mrf.mxu3 }
 0x118   : > { %v331_v28 = vadd.f32 %v308_v26, %v273_v24  ;;  %v332_v29 = vadd.f32 %v328_v27, %v274_v25 }
 0x119   : > { %v367_v30 = vpop.f32.mrf.mxu0  ;;  %v387_v31 = vpop.f32.mrf.mxu1 }
 0x11a   : > { %v390_v32 = vadd.f32 %v367_v30, %v331_v28  ;;  %v391_v33 = vadd.f32 %v387_v31, %v332_v29 }
 0x11c   : > { %392 = vst [vmem:[%s206_s9] sm:$0xff] %v390_v32 }
 0x11d   : > { %393 = vst [vmem:[%s206_s9 + $0x8] sm:$0xff] %v391_v33 }
 0x11e   : > { %652 = shalt.err (!%p649_p13)
}
 0x11f   : > { %528 = dma.vmem_to_hbm [thread:$0]  (%p783_p9), %s411_s10, 256, %s413_s18, %s395_s15  }
 0x120 PF: > { %s424_s11 = sand.u32 1, %s687_s12   ;;  %p535_p0 = pnand %p500_p12, %p790_p11 }
 0x121   : > { %s425_s30 = scalar_lea.sflag [#allocation4], %s424_s11 }
 0x122   : > { %p536_p1 = pneg %p535_p0 }
 0x124   : > { %682 = dma.done.wait (%p536_p1), %s425_s30, 256  }
 0x125   : > { %684 = vsyncadd (%p536_p1), %s425_s30, 4294967040  ;;  %s19_s17 = sadd.s32 1, %s707_s17   ;;  %s873_s12 = smov %s691_s13 }
 0x126   : > { %p16_p2 = scmp.ge.s32.totalorder %s19_s17, 4   ;;  %s874_s13 = smov %s695_s14 }
 0x127   : > { %s875_s14 = smov %s788_s26  ;;  %s876_s15 = smov %s703_s16 }
 0x128   : > { %s877_s16 = smov %s879_s20  ;;  %18 = sbr.rel (!%p16_p2) target bundleno = 6 (0x6), region = 77 }
 0x12d   :  { %431 = vsyncpa [#allocation3], 1 }
 0x12e   :  { %433 = vsyncpa [#allocation3 + $0x1], 1 }
 0x12f   :  { %434 = vsyncpa [#allocation4], 1 }
 0x130   :  { %436 = vsyncpa [#allocation4 + $0x1], 1 }

</bundles_post_ra>
